<compile_context>
chip_gen: v7x
topology: tpu7x:2x2x1
jax: 0.10.0
libtpu: 0.0.40
codegen_flags: <defaults>
</compile_context>

<pallas_src>
import functools

import jax
import jax.numpy as jnp
from jax.experimental import pallas as pl
from jax.experimental.pallas import tpu as pltpu


def _round_up(n, m):
    return ((n + m - 1) // m) * m


def _clustering_nn_kernel(x_ref, h_ref, w1_ref, b1_ref, w2_ref, b2_ref,
                          emb_ref, w3_ref, b3_ref, w4_ref, b4_ref,
                          clust_ref, aux_ref, uzg_ref, *, nb_classes):
    f32 = jnp.float32

    # ---- ClusterHead: relu(h @ W1 + b1) @ W2 + b2 (f32 MXU accumulation) ----
    hid = jnp.dot(h_ref[...], w1_ref[...], preferred_element_type=f32)
    hid = jnp.maximum(hid + b1_ref[...].astype(f32), 0.0)
    clust = jnp.dot(hid.astype(w2_ref.dtype), w2_ref[...],
                    preferred_element_type=f32) + b2_ref[...].astype(f32)
    # Output block is only nb_classes lanes wide (no HBM write of padding).
    clust_ref[...] = clust[:, :nb_classes].astype(clust_ref.dtype)

    # ---- argmax over the real classes (first-max tie-break, like torch) ----
    bb, c_pad = clust.shape
    col = jax.lax.broadcasted_iota(jnp.int32, (bb, c_pad), 1)
    masked = jnp.where(col < nb_classes, clust, -jnp.inf)   # hide padded classes
    row_max = jnp.max(masked, axis=1, keepdims=True)
    yhat = jnp.min(jnp.where(masked == row_max, col, c_pad),
                   axis=1, keepdims=True)                    # [bb, 1] int32

    # ---- global gates: tanh(Embedding[yhat]) via one-hot matmul (MXU gather)
    one_hot = (col == yhat).astype(emb_ref.dtype)            # [bb, c_pad]
    u_zg = jnp.tanh(jnp.dot(one_hot, emb_ref[...], preferred_element_type=f32))
    uzg_ref[...] = u_zg.astype(uzg_ref.dtype)

    # ---- hard thresholding (eval mode) + gated aux input ----
    # TODO(synk): training-mode Gaussian noise (std=0.5, scaled by 0.5) is not
    # implemented; eval-mode forward is deterministic: clamp(u_zg + 0.5, 0, 1).
    gate = jnp.clip(u_zg + 0.5, 0.0, 1.0)
    aux_in = x_ref[...].astype(f32) * gate

    # ---- AuxClassifier: relu(aux_in @ W3 + b3) @ W4 + b4 ----
    hid2 = jnp.dot(aux_in.astype(w3_ref.dtype), w3_ref[...],
                   preferred_element_type=f32)
    hid2 = jnp.maximum(hid2 + b3_ref[...].astype(f32), 0.0)
    aux = jnp.dot(hid2.astype(w4_ref.dtype), w4_ref[...],
                  preferred_element_type=f32) + b4_ref[...].astype(f32)
    aux_ref[...] = aux[:, :nb_classes].astype(aux_ref.dtype)


@functools.partial(jax.jit, static_argnames=("block_b", "compute_dtype"))
def clustering_nn_forward(x, h, w1, b1, w2, b2, emb, w3, b3, w4, b4, *,
                          block_b=1024, compute_dtype=jnp.float32):
    """ClusteringNN forward.

    x: [B, input_dim], h: [B, latent_dim]
    w1: [latent_dim, hidden], b1: [hidden]
    w2: [hidden, nb_classes], b2: [nb_classes]
    emb: [nb_classes, input_dim]
    w3: [input_dim, hidden],  b3: [hidden]
    w4: [hidden, nb_classes], b4: [nb_classes]
    Returns (clust_logits [B, C], aux_logits [B, C], u_zg [B, input_dim]).
    """
    B, input_dim = x.shape
    _, latent_dim = h.shape
    nb_classes = w2.shape[1]

    LANE, SUB = 128, 8
    f32 = jnp.float32
    cdt = compute_dtype

    # Lane-padded resident (weight N-dim) sizes only; streamed arrays keep
    # their true feature widths.
    h_pad = _round_up(w1.shape[1], LANE)
    c_pad = _round_up(nb_classes, LANE)

    # MXU/sublane-aligned batch tile, large enough to amortize per-step
    # pipeline overhead; keep >= 2 tiles (when B > 8) so both v7x TCs get work.
    bb = min(block_b, _round_up(B, SUB))
    if B > SUB:
        bb = min(bb, _round_up(-(-B // 2), SUB))
    bb = max(SUB, (bb // SUB) * SUB)
    b_pad = _round_up(B, bb)
    grid = (b_pad // bb,)

    def pad2(a, rows, cols, dtype):
        a = a.astype(dtype)
        return jnp.pad(a, ((0, rows - a.shape[0]), (0, cols - a.shape[1])))

    # Streamed: only batch rows padded (last dim stays the true width).
    xp = pad2(x, b_pad, input_dim, cdt)
    hp = pad2(h, b_pad, latent_dim, cdt)
    # Resident: pad lane (N) dims to 128 so intermediate activations are
    # full-lane tiles; biases stay f32.
    w1p = pad2(w1, latent_dim, h_pad, cdt)
    b1p = pad2(b1.reshape(1, -1), 1, h_pad, f32)
    w2p = pad2(w2, h_pad, c_pad, cdt)
    b2p = pad2(b2.reshape(1, -1), 1, c_pad, f32)
    embp = pad2(emb, c_pad, input_dim, cdt)
    w3p = pad2(w3, input_dim, h_pad, cdt)
    b3p = pad2(b3.reshape(1, -1), 1, h_pad, f32)
    w4p = pad2(w4, h_pad, c_pad, cdt)
    b4p = pad2(b4.reshape(1, -1), 1, c_pad, f32)

    stream = lambda shape: pl.BlockSpec(shape, lambda i: (i, 0))
    resident = lambda shape: pl.BlockSpec(shape, lambda i: (0, 0))  # fetched once

    # Explicit scoped-VMEM budget (estimated need + slack, clamped 32..64 MiB)
    # so large batch tiles also compile on v5e's 16 MiB default.
    def vbytes(r, c, dt):
        return _round_up(r, SUB) * _round_up(c, LANE) * jnp.dtype(dt).itemsize

    vmem_need = 2 * (vbytes(bb, input_dim, cdt) + vbytes(bb, latent_dim, cdt)
                     + 2 * vbytes(bb, nb_classes, f32)
                     + vbytes(bb, input_dim, f32))
    vmem_need += 2 * (vbytes(latent_dim, h_pad, cdt) + vbytes(h_pad, c_pad, cdt)
                      + vbytes(c_pad, input_dim, cdt) + vbytes(input_dim, h_pad, cdt)
                      + vbytes(h_pad, c_pad, cdt)
                      + 2 * vbytes(1, h_pad, f32) + 2 * vbytes(1, c_pad, f32))
    vmem_limit = int(min(max(vmem_need + (8 << 20), 32 << 20), 64 << 20))

    kernel = functools.partial(_clustering_nn_kernel, nb_classes=nb_classes)

    clust_p, aux_p, uzg_p = pl.pallas_call(
        kernel,
        out_shape=(
            jax.ShapeDtypeStruct((b_pad, nb_classes), f32),
            jax.ShapeDtypeStruct((b_pad, nb_classes), f32),
            jax.ShapeDtypeStruct((b_pad, input_dim), f32),
        ),
        grid_spec=pltpu.PrefetchScalarGridSpec(
            num_scalar_prefetch=0,
            grid=grid,
            in_specs=[
                stream((bb, input_dim)),        # X tile (streamed, unpadded lanes)
                stream((bb, latent_dim)),       # h tile (streamed)
                resident((latent_dim, h_pad)),  # W1
                resident((1, h_pad)),           # b1
                resident((h_pad, c_pad)),       # W2
                resident((1, c_pad)),           # b2
                resident((c_pad, input_dim)),   # embedding table
                resident((input_dim, h_pad)),   # W3
                resident((1, h_pad)),           # b3
                resident((h_pad, c_pad)),       # W4
                resident((1, c_pad)),           # b4
            ],
            out_specs=(
                stream((bb, nb_classes)),       # clust_logits (true width)
                stream((bb, nb_classes)),       # aux_logits
                stream((bb, input_dim)),        # u_zg
            ),
        ),
        compiler_params=pltpu.CompilerParams(
            dimension_semantics=("parallel",),  # batch tiles shard across TCs (v7x)
            vmem_limit_bytes=vmem_limit,
        ),
    )(xp, hp, w1p, b1p, w2p, b2p, embp, w3p, b3p, w4p, b4p)

    return clust_p[:B], aux_p[:B], uzg_p[:B]


def init_clustering_nn_params(key, input_dim, latent_dim, hidden_dim, nb_classes,
                              dtype=jnp.float32):
    """Mirrors init_weights_normal: Linear weights ~ N(0, 0.001), biases zero,
    Embedding ~ N(0, 0.01). (PyTorch's default Linear bias init is not
    reproduced; zeros used for a deterministic synthetic test.)
    Weights are stored [in, out] (transpose of torch Linear.weight)."""
    k = jax.random.split(key, 5)
    w1 = (0.001 * jax.random.normal(k[0], (latent_dim, hidden_dim))).astype(dtype)
    b1 = jnp.zeros((hidden_dim,), dtype)
    w2 = (0.001 * jax.random.normal(k[1], (hidden_dim, nb_classes))).astype(dtype)
    b2 = jnp.zeros((nb_classes,), dtype)
    emb = (0.01 * jax.random.normal(k[2], (nb_classes, input_dim))).astype(dtype)
    w3 = (0.001 * jax.random.normal(k[3], (input_dim, hidden_dim))).astype(dtype)
    b3 = jnp.zeros((hidden_dim,), dtype)
    w4 = (0.001 * jax.random.normal(k[4], (hidden_dim, nb_classes))).astype(dtype)
    b4 = jnp.zeros((nb_classes,), dtype)
    return w1, b1, w2, b2, emb, w3, b3, w4, b4


def _reference_forward(x, h, params):
    w1, b1, w2, b2, emb, w3, b3, w4, b4 = params
    prec = jax.lax.Precision.HIGHEST
    ref_hid = jnp.maximum(jnp.dot(h, w1, precision=prec) + b1, 0.0)
    ref_clust = jnp.dot(ref_hid, w2, precision=prec) + b2
    yhat = jnp.argmax(ref_clust, axis=1)
    ref_uzg = jnp.tanh(emb[yhat])
    gate = jnp.clip(ref_uzg + 0.5, 0.0, 1.0)
    aux_in = x * gate
    ref_hid2 = jnp.maximum(jnp.dot(aux_in, w3, precision=prec) + b3, 0.0)
    ref_aux = jnp.dot(ref_hid2, w4, precision=prec) + b4
    return ref_clust, ref_aux, ref_uzg


if __name__ == "__main__":
    key = jax.random.PRNGKey(0)
    kx, kh, kp = jax.random.split(key, 3)

    # Small shapes consistent with the module: X [B, input_dim], h [B, latent_dim].
    input_dim, latent_dim, hidden_dim, nb_classes = 32, 16, 64, 10
    params = init_clustering_nn_params(kp, input_dim, latent_dim, hidden_dim,
                                       nb_classes)

    for B in (16, 19):  # 19 exercises batch padding + the 2-tile split
        x = jax.random.normal(kx, (B, input_dim), dtype=jnp.float32)
        h = jax.random.normal(kh, (B, latent_dim), dtype=jnp.float32)

        clust, aux, u_zg = clustering_nn_forward(x, h, *params)
        clust, aux, u_zg = jax.block_until_ready((clust, aux, u_zg))

        ref_clust, ref_aux, ref_uzg = _reference_forward(x, h, params)

        assert clust.shape == (B, nb_classes)
        assert aux.shape == (B, nb_classes)
        assert u_zg.shape == (B, input_dim)
        assert jnp.allclose(clust, ref_clust, atol=1e-5, rtol=1e-4)
        assert jnp.allclose(u_zg, ref_uzg, atol=1e-5, rtol=1e-4)
        assert jnp.allclose(aux, ref_aux, atol=1e-5, rtol=1e-4)

    print("KERNEL_OK")
</pallas_src>

<mosaic_0001>
module attributes {stable_mosaic.version = 11 : i64} {
  func.func @_clustering_nn_kernel(%arg0: i32, %arg1: memref<8x32xf32, #tpu.memory_space<vmem>>, %arg2: memref<8x16xf32, #tpu.memory_space<vmem>>, %arg3: memref<16x128xf32, #tpu.memory_space<vmem>>, %arg4: memref<1x128xf32, #tpu.memory_space<vmem>>, %arg5: memref<128x128xf32, #tpu.memory_space<vmem>>, %arg6: memref<1x128xf32, #tpu.memory_space<vmem>>, %arg7: memref<128x32xf32, #tpu.memory_space<vmem>>, %arg8: memref<32x128xf32, #tpu.memory_space<vmem>>, %arg9: memref<1x128xf32, #tpu.memory_space<vmem>>, %arg10: memref<128x128xf32, #tpu.memory_space<vmem>>, %arg11: memref<1x128xf32, #tpu.memory_space<vmem>>, %arg12: memref<8x10xf32, #tpu.memory_space<vmem>>, %arg13: memref<8x10xf32, #tpu.memory_space<vmem>>, %arg14: memref<8x32xf32, #tpu.memory_space<vmem>>) attributes {dimension_semantics = [#tpu.dimension_semantics<parallel>], iteration_bounds = array<i64: 2>, scalar_prefetch = 0 : i64, scratch_operands = 0 : i64, tpu.core_type = #tpu.core_type<tc>, window_params = [{transform_indices = @transform_0, window_bounds = array<i64: 8, 32>}, {transform_indices = @transform_1, window_bounds = array<i64: 8, 16>}, {pipeline_mode = #tpu.pipeline_mode<synchronous>, transform_indices = @transform_2, window_bounds = array<i64: 16, 128>}, {pipeline_mode = #tpu.pipeline_mode<synchronous>, transform_indices = @transform_3, window_bounds = array<i64: 1, 128>}, {pipeline_mode = #tpu.pipeline_mode<synchronous>, transform_indices = @transform_4, window_bounds = array<i64: 128, 128>}, {pipeline_mode = #tpu.pipeline_mode<synchronous>, transform_indices = @transform_5, window_bounds = array<i64: 1, 128>}, {pipeline_mode = #tpu.pipeline_mode<synchronous>, transform_indices = @transform_6, window_bounds = array<i64: 128, 32>}, {pipeline_mode = #tpu.pipeline_mode<synchronous>, transform_indices = @transform_7, window_bounds = array<i64: 32, 128>}, {pipeline_mode = #tpu.pipeline_mode<synchronous>, transform_indices = @transform_8, window_bounds = array<i64: 1, 128>}, {pipeline_mode = #tpu.pipeline_mode<synchronous>, transform_indices = @transform_9, window_bounds = array<i64: 128, 128>}, {pipeline_mode = #tpu.pipeline_mode<synchronous>, transform_indices = @transform_10, window_bounds = array<i64: 1, 128>}, {transform_indices = @transform_11, window_bounds = array<i64: 8, 10>}, {transform_indices = @transform_12, window_bounds = array<i64: 8, 10>}, {transform_indices = @transform_13, window_bounds = array<i64: 8, 32>}]} {
    %c0 = arith.constant 0 : index
    %c0_0 = arith.constant 0 : index
    %0 = vector.load %arg2[%c0, %c0_0] : memref<8x16xf32, #tpu.memory_space<vmem>>, vector<8x16xf32>
    %c0_1 = arith.constant 0 : index
    %c0_2 = arith.constant 0 : index
    %1 = vector.load %arg3[%c0_1, %c0_2] : memref<16x128xf32, #tpu.memory_space<vmem>>, vector<16x128xf32>
    %cst = arith.constant dense<0.000000e+00> : vector<8x128xf32>
    %2 = tpu.matmul %0, %1, %cst {dimension_numbers = #tpu.dot_dimension_numbers<[1], [0], [0], [1], [0, 0, 1, 1], [], []>} : vector<8x16xf32>, vector<16x128xf32>, vector<8x128xf32> -> vector<8x128xf32>
    %c0_3 = arith.constant 0 : index
    %c0_4 = arith.constant 0 : index
    %3 = vector.load %arg4[%c0_3, %c0_4] : memref<1x128xf32, #tpu.memory_space<vmem>>, vector<1x128xf32>
    %4 = vector.broadcast %3 : vector<1x128xf32> to vector<8x128xf32>
    %5 = arith.addf %2, %4 : vector<8x128xf32>
    %cst_5 = arith.constant 0.000000e+00 : f32
    %6 = vector.broadcast %cst_5 : f32 to vector<8x128xf32>
    %7 = arith.maximumf %5, %6 : vector<8x128xf32>
    %c0_6 = arith.constant 0 : index
    %c0_7 = arith.constant 0 : index
    %8 = vector.load %arg5[%c0_6, %c0_7] : memref<128x128xf32, #tpu.memory_space<vmem>>, vector<128x128xf32>
    %cst_8 = arith.constant dense<0.000000e+00> : vector<8x128xf32>
    %9 = tpu.matmul %7, %8, %cst_8 {dimension_numbers = #tpu.dot_dimension_numbers<[1], [0], [0], [1], [0, 0, 1, 1], [], []>} : vector<8x128xf32>, vector<128x128xf32>, vector<8x128xf32> -> vector<8x128xf32>
    %c0_9 = arith.constant 0 : index
    %c0_10 = arith.constant 0 : index
    %10 = vector.load %arg6[%c0_9, %c0_10] : memref<1x128xf32, #tpu.memory_space<vmem>>, vector<1x128xf32>
    %11 = vector.broadcast %10 : vector<1x128xf32> to vector<8x128xf32>
    %12 = arith.addf %9, %11 : vector<8x128xf32>
    %13 = vector.extract_strided_slice %12 {offsets = [0, 0], sizes = [8, 10], strides = [1, 1]} : vector<8x128xf32> to vector<8x10xf32>
    %c0_11 = arith.constant 0 : index
    %c0_12 = arith.constant 0 : index
    %14 = vector.load %arg12[%c0_11, %c0_12] : memref<8x10xf32, #tpu.memory_space<vmem>>, vector<8x10xf32>
    tpu.vector_store %arg12[%c0_11, %c0_12], %13 {strides = array<i32>} : memref<8x10xf32, #tpu.memory_space<vmem>>, vector<8x10xf32>,
    %15 = tpu.iota {dimensions = array<i32: 1>} : vector<8x128xi32>
    %c10_i32 = arith.constant 10 : i32
    %16 = vector.broadcast %c10_i32 : i32 to vector<8x128xi32>
    %17 = arith.cmpi slt, %15, %16 : vector<8x128xi32>
    %cst_13 = arith.constant 0xFF800000 : f32
    %18 = vector.broadcast %cst_13 : f32 to vector<8x128xf32>
    %19 = arith.select %17, %12, %18 : vector<8x128xi1>, vector<8x128xf32>
    %cst_14 = arith.constant dense<0xFF800000> : vector<8xf32>
    %20 = vector.multi_reduction <maximumf>, %19, %cst_14 [1] : vector<8x128xf32> to vector<8xf32>
    %21 = vector.shape_cast %20 : vector<8xf32> to vector<8x1xf32>
    %22 = vector.broadcast %21 : vector<8x1xf32> to vector<8x128xf32>
    %23 = arith.cmpf oeq, %19, %22 : vector<8x128xf32>
    %c128_i32 = arith.constant 128 : i32
    %24 = vector.broadcast %c128_i32 : i32 to vector<8x128xi32>
    %25 = arith.select %23, %15, %24 : vector<8x128xi1>, vector<8x128xi32>
    %cst_15 = arith.constant dense<2147483647> : vector<8xi32>
    %26 = vector.multi_reduction <minsi>, %25, %cst_15 [1] : vector<8x128xi32> to vector<8xi32>
    %27 = vector.shape_cast %26 : vector<8xi32> to vector<8x1xi32>
    %28 = vector.broadcast %27 : vector<8x1xi32> to vector<8x128xi32>
    %29 = arith.cmpi eq, %15, %28 : vector<8x128xi32>
    %30 = arith.extui %29 : vector<8x128xi1> to vector<8x128xi32>
    %31 = arith.sitofp %30 : vector<8x128xi32> to vector<8x128xf32>
    %c0_16 = arith.constant 0 : index
    %c0_17 = arith.constant 0 : index
    %32 = vector.load %arg7[%c0_16, %c0_17] : memref<128x32xf32, #tpu.memory_space<vmem>>, vector<128x32xf32>
    %cst_18 = arith.constant dense<0.000000e+00> : vector<8x32xf32>
    %33 = tpu.matmul %31, %32, %cst_18 {dimension_numbers = #tpu.dot_dimension_numbers<[1], [0], [0], [1], [0, 0, 1, 1], [], []>} : vector<8x128xf32>, vector<128x32xf32>, vector<8x32xf32> -> vector<8x32xf32>
    %34 = math.tanh %33 : vector<8x32xf32>
    %c0_19 = arith.constant 0 : index
    %c0_20 = arith.constant 0 : index
    %35 = vector.load %arg14[%c0_19, %c0_20] : memref<8x32xf32, #tpu.memory_space<vmem>>, vector<8x32xf32>
    tpu.vector_store %arg14[%c0_19, %c0_20], %34 {strides = array<i32>} : memref<8x32xf32, #tpu.memory_space<vmem>>, vector<8x32xf32>,
    %cst_21 = arith.constant 5.000000e-01 : f32
    %36 = vector.broadcast %cst_21 : f32 to vector<8x32xf32>
    %37 = arith.addf %34, %36 : vector<8x32xf32>
    %cst_22 = arith.constant 0.000000e+00 : f32
    %cst_23 = arith.constant 1.000000e+00 : f32
    %38 = vector.broadcast %cst_22 : f32 to vector<8x32xf32>
    %39 = arith.maximumf %38, %37 : vector<8x32xf32>
    %40 = vector.broadcast %cst_23 : f32 to vector<8x32xf32>
    %41 = arith.minimumf %40, %39 : vector<8x32xf32>
    %c0_24 = arith.constant 0 : index
    %c0_25 = arith.constant 0 : index
    %42 = vector.load %arg1[%c0_24, %c0_25] : memref<8x32xf32, #tpu.memory_space<vmem>>, vector<8x32xf32>
    %43 = arith.mulf %42, %41 : vector<8x32xf32>
    %c0_26 = arith.constant 0 : index
    %c0_27 = arith.constant 0 : index
    %44 = vector.load %arg8[%c0_26, %c0_27] : memref<32x128xf32, #tpu.memory_space<vmem>>, vector<32x128xf32>
    %cst_28 = arith.constant dense<0.000000e+00> : vector<8x128xf32>
    %45 = tpu.matmul %43, %44, %cst_28 {dimension_numbers = #tpu.dot_dimension_numbers<[1], [0], [0], [1], [0, 0, 1, 1], [], []>} : vector<8x32xf32>, vector<32x128xf32>, vector<8x128xf32> -> vector<8x128xf32>
    %c0_29 = arith.constant 0 : index
    %c0_30 = arith.constant 0 : index
    %46 = vector.load %arg9[%c0_29, %c0_30] : memref<1x128xf32, #tpu.memory_space<vmem>>, vector<1x128xf32>
    %47 = vector.broadcast %46 : vector<1x128xf32> to vector<8x128xf32>
    %48 = arith.addf %45, %47 : vector<8x128xf32>
    %cst_31 = arith.constant 0.000000e+00 : f32
    %49 = vector.broadcast %cst_31 : f32 to vector<8x128xf32>
    %50 = arith.maximumf %48, %49 : vector<8x128xf32>
    %c0_32 = arith.constant 0 : index
    %c0_33 = arith.constant 0 : index
    %51 = vector.load %arg10[%c0_32, %c0_33] : memref<128x128xf32, #tpu.memory_space<vmem>>, vector<128x128xf32>
    %cst_34 = arith.constant dense<0.000000e+00> : vector<8x128xf32>
    %52 = tpu.matmul %50, %51, %cst_34 {dimension_numbers = #tpu.dot_dimension_numbers<[1], [0], [0], [1], [0, 0, 1, 1], [], []>} : vector<8x128xf32>, vector<128x128xf32>, vector<8x128xf32> -> vector<8x128xf32>
    %c0_35 = arith.constant 0 : index
    %c0_36 = arith.constant 0 : index
    %53 = vector.load %arg11[%c0_35, %c0_36] : memref<1x128xf32, #tpu.memory_space<vmem>>, vector<1x128xf32>
    %54 = vector.broadcast %53 : vector<1x128xf32> to vector<8x128xf32>
    %55 = arith.addf %52, %54 : vector<8x128xf32>
    %56 = vector.extract_strided_slice %55 {offsets = [0, 0], sizes = [8, 10], strides = [1, 1]} : vector<8x128xf32> to vector<8x10xf32>
    %c0_37 = arith.constant 0 : index
    %c0_38 = arith.constant 0 : index
    %57 = vector.load %arg13[%c0_37, %c0_38] : memref<8x10xf32, #tpu.memory_space<vmem>>, vector<8x10xf32>
    tpu.vector_store %arg13[%c0_37, %c0_38], %56 {strides = array<i32>} : memref<8x10xf32, #tpu.memory_space<vmem>>, vector<8x10xf32>,
    return
  }
  func.func @transform_0(%arg0: i32) -> (i32, i32) {
    %c0_i32 = arith.constant 0 : i32
    %c0_i32_0 = arith.constant 0 : i32
    return %arg0, %c0_i32 : i32, i32
  }
  func.func @transform_1(%arg0: i32) -> (i32, i32) {
    %c0_i32 = arith.constant 0 : i32
    %c0_i32_0 = arith.constant 0 : i32
    return %arg0, %c0_i32 : i32, i32
  }
  func.func @transform_2(%arg0: i32) -> (i32, i32) {
    %c0_i32 = arith.constant 0 : i32
    %c0_i32_0 = arith.constant 0 : i32
    %c0_i32_1 = arith.constant 0 : i32
    return %c0_i32, %c0_i32_0 : i32, i32
  }
  func.func @transform_3(%arg0: i32) -> (i32, i32) {
    %c0_i32 = arith.constant 0 : i32
    %c0_i32_0 = arith.constant 0 : i32
    %c0_i32_1 = arith.constant 0 : i32
    return %c0_i32, %c0_i32_0 : i32, i32
  }
  func.func @transform_4(%arg0: i32) -> (i32, i32) {
    %c0_i32 = arith.constant 0 : i32
    %c0_i32_0 = arith.constant 0 : i32
    %c0_i32_1 = arith.constant 0 : i32
    return %c0_i32, %c0_i32_0 : i32, i32
  }
  func.func @transform_5(%arg0: i32) -> (i32, i32) {
    %c0_i32 = arith.constant 0 : i32
    %c0_i32_0 = arith.constant 0 : i32
    %c0_i32_1 = arith.constant 0 : i32
    return %c0_i32, %c0_i32_0 : i32, i32
  }
  func.func @transform_6(%arg0: i32) -> (i32, i32) {
    %c0_i32 = arith.constant 0 : i32
    %c0_i32_0 = arith.constant 0 : i32
    %c0_i32_1 = arith.constant 0 : i32
    return %c0_i32, %c0_i32_0 : i32, i32
  }
  func.func @transform_7(%arg0: i32) -> (i32, i32) {
    %c0_i32 = arith.constant 0 : i32
    %c0_i32_0 = arith.constant 0 : i32
    %c0_i32_1 = arith.constant 0 : i32
    return %c0_i32, %c0_i32_0 : i32, i32
  }
  func.func @transform_8(%arg0: i32) -> (i32, i32) {
    %c0_i32 = arith.constant 0 : i32
    %c0_i32_0 = arith.constant 0 : i32
    %c0_i32_1 = arith.constant 0 : i32
    return %c0_i32, %c0_i32_0 : i32, i32
  }
  func.func @transform_9(%arg0: i32) -> (i32, i32) {
    %c0_i32 = arith.constant 0 : i32
    %c0_i32_0 = arith.constant 0 : i32
    %c0_i32_1 = arith.constant 0 : i32
    return %c0_i32, %c0_i32_0 : i32, i32
  }
  func.func @transform_10(%arg0: i32) -> (i32, i32) {
    %c0_i32 = arith.constant 0 : i32
    %c0_i32_0 = arith.constant 0 : i32
    %c0_i32_1 = arith.constant 0 : i32
    return %c0_i32, %c0_i32_0 : i32, i32
  }
  func.func @transform_11(%arg0: i32) -> (i32, i32) {
    %c0_i32 = arith.constant 0 : i32
    %c0_i32_0 = arith.constant 0 : i32
    return %arg0, %c0_i32 : i32, i32
  }
  func.func @transform_12(%arg0: i32) -> (i32, i32) {
    %c0_i32 = arith.constant 0 : i32
    %c0_i32_0 = arith.constant 0 : i32
    return %arg0, %c0_i32 : i32, i32
  }
  func.func @transform_13(%arg0: i32) -> (i32, i32) {
    %c0_i32 = arith.constant 0 : i32
    %c0_i32_0 = arith.constant 0 : i32
    return %arg0, %c0_i32 : i32, i32
  }
}

</mosaic_0001>

<bundles_post_ra>
// kernel: clustering_nn_forward.1
= control target key start
LH: loop header
LB: loop body
LE: loop exit
PB: predicated region body
PF: predicated region fallthrough
CT: control target
= control target key end

     0   :  { %s2084_s0 = inlined_call_operand.vmem [shape: f32[16,32], index: 0, kind: input, shape index: {}]   ;;  %s2085_s1 = inlined_call_operand.vmem [shape: f32[16,16], index: 1, kind: input, shape index: {}]   ;;  %s2086_s2 = inlined_call_operand.vmem [shape: f32[16,128], index: 2, kind: input, shape index: {}]   ;;  %s2087_s3 = inlined_call_operand.vmem [shape: f32[1,128], index: 3, kind: input, shape index: {}]   ;;  %s2088_s4 = inlined_call_operand.vmem [shape: f32[128,128], index: 4, kind: input, shape index: {}]   ;;  %s2089_s5 = inlined_call_operand.vmem [shape: f32[1,128], index: 5, kind: input, shape index: {}]   ;;  %s2090_s6 = inlined_call_operand.vmem [shape: f32[128,32], index: 6, kind: input, shape index: {}]   ;;  %s2091_s7 = inlined_call_operand.vmem [shape: f32[32,128], index: 7, kind: input, shape index: {}]   ;;  %s2092_s8 = inlined_call_operand.vmem [shape: f32[1,128], index: 8, kind: input, shape index: {}]   ;;  %s2093_s9 = inlined_call_operand.vmem [shape: f32[128,128], index: 9, kind: input, shape index: {}]   ;;  %s2094_s10 = inlined_call_operand.vmem [shape: f32[1,128], index: 10, kind: input, shape index: {}]   ;;  %s2095_s11 = inlined_call_operand.hbm [shape: f32[16,10], index: 11, kind: output, shape index: {0}]   ;;  %s2096_s12 = inlined_call_operand.hbm [shape: f32[16,10], index: 12, kind: output, shape index: {1}]   ;;  %s2097_s13 = inlined_call_operand.hbm [shape: f32[16,32], index: 13, kind: output, shape index: {2}]  }
   0x1   :  { %2103 = sst [smem:[#allocation10_spill]] %s2084_s0 }
   0x2   :  { %2104 = sst [smem:[#allocation11_spill]] %s2085_s1 }
   0x3   :  { %2105 = sst [smem:[#allocation12_spill]] %s2086_s2 }
   0x4   :  { %2106 = sst [smem:[#allocation13_spill]] %s2087_s3 }
   0x5   :  { %2107 = sst [smem:[#allocation14_spill]] %s2088_s4 }
   0x6   :  { %2108 = sst [smem:[#allocation15_spill]] %s2089_s5 }
   0x7   :  { %19 = vsyncpa [#allocation3], 0 }
   0x8   :  { %21 = vsyncpa [#allocation3 + $0x1], 0 }
   0x9   :  { %22 = vsyncpa [#allocation5], 0 }
   0xa   :  { %24 = vsyncpa [#allocation5 + $0x1], 0  ;;  %s1675_s25 = smov 0   ;;  %s1677_s26 = smov 0  }
   0xb   :  { %s1679_s27 = smov 0   ;;  %s1681_s28 = smov 0  }
   0xc LB: > { %s1696_s29 = sadd.s32 4294967295, %s1596_s28   ;;  %s2098_s30 = sadd.s32 4294967294, %s1596_s28   ;;  %s1596_s28 = sphi %s1681_s28, %s2127_s28   ;;  %s1592_s27 = sphi %s1679_s27, %s2126_s27   ;;  %s1588_s26 = sphi %s1677_s26, %s2125_s26   ;;  %s1584_s25 = sphi %s1675_s25, %s2124_s25  }
   0xd   : > { %s1700_s14 = sadd.s32 1, %s1596_s28   ;;  %s278_s15 = sadd.s32 1, %s1592_s27 }
   0xe   : > { %s275_s16 = ssub.s32 %s1596_s28, %s1700_s14  ;;  %p288_p0 = scmp.ne.s32.totalorder %s1592_s27, %s1588_s26 }
   0xf   : > { %p276_p1 = scmp.eq.s32.totalorder %s275_s16, 0  ;;  %p289_p2 = scmp.eq.s32.totalorder %s1696_s29, 1 }
  0x10   : > { %p294_p3 = scmp.ne.s32.totalorder %s1588_s26, %s1584_s25  ;;  %p295_p4 = scmp.eq.s32.totalorder %s2098_s30, 1 }
  0x11   : > { %s1713_s17 = scalar_select %p276_p1, %s1592_s27, %s278_s15  }
  0x12   : > { %p1715_p5 = por %p289_p2, %p288_p0  ;;  %p1719_p6 = por %p295_p4, %p294_p3 }
  0x13   : > { %2109 = sst [smem:[#allocation9_spill]] %s1713_s17  ;;  %p1134_p7 = scmp.ge.s32.totalorder %s1596_s28, 1 }
  0x14   : > { %p406_p8 = scmp.lt.s32.totalorder %s1596_s28, 3 }
  0x16   : > { %p407_p9 = pnand %p1134_p7, %p406_p8 }
  0x17   : > { %s2112_s2 = sld [smem:[#allocation12_spill]] (!%p407_p9)  ;;  %p463_p10 = scmp.lt.s32.totalorder (!%p407_p9), %s1696_s29, 1  ;;  %v1598_v2 = vmov (!%p407_p9), 0.0|0.0   ;;  %vm1599_vm0 = vmmov (!%p407_p9), 0   ;;  %v1600_v4 = vmov (!%p407_p9), 0.0   ;;  %vm481_vm1 = vcmask (!%p407_p9), 130048  }
  0x18   : > { %410 = sbr.rel (%p407_p9) target bundleno = 1603 (0x643), region = 64  ;;  %1338 = vmatprep.subr.bf16.mxu1 (!%p407_p9), %v1598_v2  ;;  %1219 = vmatprep.mubr.msk.f32.mxu1 (!%p407_p9), %vm1599_vm0, %v1600_v4  ;;  %s2113_s4 = sld [smem:[#allocation14_spill]] (!%p407_p9)  ;;  %v651_v35 = vlaneseq (!%p407_p9)  ;;  %vm649_vm3 = vcmask (!%p407_p9), 80896   ;;  %v676_v46 = vld [vmem:[%s2090_s6] sm:$0xff] (!%p407_p9)  ;;  %v677_v47 = vld [vmem:[%s2090_s6 + $0x8] sm:$0xff] (!%p407_p9)  ;;  %v678_v48 = vld [vmem:[%s2090_s6 + $0x10] sm:$0xff] (!%p407_p9) }
  0x19   : > { %1365 = vmatprep.subr.bf16.mxu0 (!%p407_p9), %v1598_v2  ;;  %1289 = vmatprep.mubr.msk.f32.mxu0 (!%p407_p9), %vm1599_vm0, %v1600_v4  ;;  %s2114_s1 = sld [smem:[#allocation11_spill]] (!%p407_p9)  ;;  %s2115_s3 = sld [smem:[#allocation13_spill]] (!%p407_p9)  ;;  %v1366_v49 = vpack.c.bf16 (!%p407_p9), %v677_v47, %v676_v46  ;;  %v679_v50 = vld [vmem:[%s2090_s6 + $0x18] sm:$0xff] (!%p407_p9)  ;;  %v680_v52 = vld [vmem:[%s2090_s6 + $0x20] sm:$0xff] (!%p407_p9)  ;;  %v681_v53 = vld [vmem:[%s2090_s6 + $0x28] sm:$0xff] (!%p407_p9)  ;;  %vm763_vm7 = vcmask (!%p407_p9), 261120  }
  0x1a   : > { %s2099_s24 = sand.u32 (!%p407_p9), 1, %s1588_s26   ;;  %v1812_v36 = vand.u32 (!%p407_p9), 127, %v651_v35  ;;  %s2116_s5 = sld [smem:[#allocation15_spill]] (!%p407_p9)  ;;  %v1369_v51 = vpack.c.bf16 (!%p407_p9), %v679_v50, %v678_v48  ;;  %v1372_v54 = vpack.c.bf16 (!%p407_p9), %v681_v53, %v680_v52  ;;  %v682_v55 = vld [vmem:[%s2090_s6 + $0x30] sm:$0xff] (!%p407_p9)  ;;  %v683_v56 = vld [vmem:[%s2090_s6 + $0x38] sm:$0xff] (!%p407_p9)  ;;  %v684_v58 = vld [vmem:[%s2090_s6 + $0x40] sm:$0xff] (!%p407_p9) }
  0x1b   : > { %s1816_s16 = sshll.u32 (!%p407_p9), %s2099_s24, 3  ;;  %1367 = vmatpush3.bf16.msra.mxu0 (!%p407_p9), %v1366_v49  ;;  %v1375_v57 = vpack.c.bf16 (!%p407_p9), %v683_v56, %v682_v55  ;;  %v685_v59 = vld [vmem:[%s2090_s6 + $0x48] sm:$0xff] (!%p407_p9)  ;;  %v686_v61 = vld [vmem:[%s2090_s6 + $0x50] sm:$0xff] (!%p407_p9)  ;;  %v687_v62 = vld [vmem:[%s2090_s6 + $0x58] sm:$0xff] (!%p407_p9)  ;;  %s2118_s0 = sld [smem:[#allocation10_spill]] (!%p407_p9) }
  0x1c   : > { %vm653_vm2 = vcmp.lt.s32.totalorder (!%p407_p9), %v1812_v36, 10  ;;  %1368 = vmatprep.subr.bf16.mxu0 (!%p407_p9), %v1598_v2  ;;  %v1378_v60 = vpack.c.bf16 (!%p407_p9), %v685_v59, %v684_v58  ;;  %v1381_v63 = vpack.c.bf16 (!%p407_p9), %v687_v62, %v686_v61  ;;  %v863_v35 = vld [vmem:[%s2093_s9 + $0x40] sm:$0xff] (!%p407_p9)  ;;  %v870_v52 = vld [vmem:[%s2093_s9 + $0x78] sm:$0xff] (!%p407_p9)  ;;  %s1602_s17 = smov (!%p407_p9), [#allocation2]  }
  0x1d   : > { %v472_v0 = vld [vmem:[%s2112_s2] sm:$0xff] (!%p407_p9)  ;;  %v473_v1 = vld [vmem:[%s2112_s2 + $0x8] sm:$0xff] (!%p407_p9) }
  0x1e   : > { %v1339_v3 = vpack.c.bf16 (!%p407_p9), %v473_v1, %v472_v0  ;;  %v556_v5 = vld [vmem:[%s2113_s4] sm:$0xff] (!%p407_p9)  ;;  %v557_v6 = vld [vmem:[%s2113_s4 + $0x8] sm:$0xff] (!%p407_p9)  ;;  %v558_v8 = vld [vmem:[%s2113_s4 + $0x10] sm:$0xff] (!%p407_p9) }
  0x1f   : > { %s1742_s21 = scalar_select %p463_p10, %s1696_s29, 1  ;;  %v1342_v7 = vpack.c.bf16 %v557_v6, %v556_v5  ;;  %v559_v9 = vld [vmem:[%s2113_s4 + $0x18] sm:$0xff]  ;;  %v560_v12 = vld [vmem:[%s2113_s4 + $0x20] sm:$0xff]  ;;  %v561_v13 = vld [vmem:[%s2113_s4 + $0x28] sm:$0xff]  ;;  %1370 = vmatpush3.bf16.msra.mxu0 %v1369_v51 }
  0x20   : > { %1340 = vmatpush3.bf16.msra.mxu1 %v1339_v3  ;;  %v1345_v11 = vpack.c.bf16 %v559_v9, %v558_v8  ;;  %v1348_v14 = vpack.c.bf16 %v561_v13, %v560_v12  ;;  %v562_v15 = vld [vmem:[%s2113_s4 + $0x30] sm:$0xff]  ;;  %v563_v16 = vld [vmem:[%s2113_s4 + $0x38] sm:$0xff]  ;;  %v564_v18 = vld [vmem:[%s2113_s4 + $0x40] sm:$0xff]  ;;  %1371 = vmatprep.subr.bf16.mxu0 %v1598_v2 }
  0x21   : > { %s2101_s22 = sshll.u32 %s1742_s21, 3  ;;  %1341 = vmatprep.subr.bf16.mxu1 %v1598_v2  ;;  %v1351_v17 = vpack.c.bf16 %v563_v16, %v562_v15  ;;  %v565_v19 = vld [vmem:[%s2113_s4 + $0x48] sm:$0xff]  ;;  %v566_v21 = vld [vmem:[%s2113_s4 + $0x50] sm:$0xff]  ;;  %v567_v22 = vld [vmem:[%s2113_s4 + $0x58] sm:$0xff]  ;;  %s2117_s23 = sshll.u32 %s1742_s21, 3 }
  0x22   : > { %s470_s15 = scalar_lea.vmem %s2114_s1, %s2101_s22  ;;  %v1354_v20 = vpack.c.bf16 %v565_v19, %v564_v18  ;;  %v1357_v23 = vpack.c.bf16 %v567_v22, %v566_v21  ;;  %v568_v24 = vld [vmem:[%s2113_s4 + $0x60] sm:$0xff]  ;;  %v569_v25 = vld [vmem:[%s2113_s4 + $0x68] sm:$0xff]  ;;  %v570_v27 = vld [vmem:[%s2113_s4 + $0x70] sm:$0xff]  ;;  %s466_s22 = scalar_lea.vmem %s2118_s0, %s2117_s23 }
  0x23   : > { %v471_v10 = vld [vmem:[%s470_s15] sm:$0xff]  ;;  %v1360_v26 = vpack.c.bf16 %v569_v25, %v568_v24  ;;  %v571_v28 = vld [vmem:[%s2113_s4 + $0x78] sm:$0xff]  ;;  %s2100_s15 = scalar_lea.vmem [#allocation2], %s1816_s16  ;;  %1373 = vmatpush3.bf16.msra.mxu0 %v1372_v54  ;;  %v689_v1 = vld [vmem:[%s2090_s6 + $0x68] sm:$0xff]  ;;  %s1966_s23 = sshll.u32 %s1696_s29, 7 }
  0x24   : > { %1220 = vmatmul.mubr.msk.f32.vlgmr.msra.gmra.mrb[0].mxu1 %vm481_vm1, %v471_v10  ;;  %v1363_v29 = vpack.c.bf16 %v571_v28, %v570_v27  ;;  %v1140_v30 = vld [vmem:[%s2115_s3] ss:$0 sm:$0xff]  ;;  %1374 = vmatprep.subr.bf16.mxu0 %v1598_v2  ;;  %v690_v9 = vld [vmem:[%s2090_s6 + $0x70] sm:$0xff]  ;;  %v691_v10 = vld [vmem:[%s2090_s6 + $0x78] sm:$0xff]  ;;  %s2102_s3 = scalar_lea.vmem [#allocation6], %s1816_s16  ;;  %s2120_s21 = sand.u32 1, %s1588_s26  }
  0x25   : > { %1343 = vmatpush3.bf16.msra.mxu1 %v1342_v7  ;;  %1254 = vmatprep.mubr.msk.f32.mxu1 %vm1599_vm0, %v1600_v4  ;;  %v1142_v37 = vld [vmem:[%s2116_s5] ss:$0 sm:$0xff]  ;;  %v771_v19 = vld [vmem:[%s2091_s7 + $0x8] sm:$0xff]  ;;  %v772_v21 = vld [vmem:[%s2091_s7 + $0x10] sm:$0xff]  ;;  %s950_s30 = scalar_lea.sflag [#allocation3], %s2120_s21 }
  0x26   : > { %1344 = vmatprep.subr.bf16.mxu1 %v1598_v2  ;;  %v688_v0 = vld [vmem:[%s2090_s6 + $0x60] sm:$0xff]  ;;  %v856_v24 = vld [vmem:[%s2093_s9 + $0x8] sm:$0xff]  ;;  %v857_v25 = vld [vmem:[%s2093_s9 + $0x10] sm:$0xff] }
  0x27   : > { %1376 = vmatpush3.bf16.msra.mxu0 %v1375_v57  ;;  %v1384_v3 = vpack.c.bf16 %v689_v1, %v688_v0  ;;  %v770_v18 = vld [vmem:[%s2091_s7] sm:$0xff]  ;;  %v858_v27 = vld [vmem:[%s2093_s9 + $0x18] sm:$0xff]  ;;  %v869_v51 = vld [vmem:[%s2093_s9 + $0x70] sm:$0xff] }
  0x28   : > { %1377 = vmatprep.subr.bf16.mxu0 %v1598_v2  ;;  %v1399_v28 = vpack.c.bf16 %v858_v27, %v857_v25  ;;  %v768_v49 = vld [vmem:[%s466_s22] sm:$0xff]  ;;  %v1417_v53 = vpack.c.bf16 %v870_v52, %v869_v51  ;;  %s1972_s22 = scalar_lea.hbm %s2095_s11, %s1966_s23 }
  0x29   : > { %1346 = vmatpush3.bf16.msra.mxu1 %v1345_v11  ;;  %v1387_v11 = vpack.c.bf16 %v691_v10, %v690_v9  ;;  %v1145_v54 = vld [vmem:[%s2092_s8] ss:$0 sm:$0xff] }
  0x2a   : > { %1347 = vmatprep.subr.bf16.mxu1 %v1598_v2 }
  0x2b   : > { %1379 = vmatpush3.bf16.msra.mxu0 %v1378_v60 }
  0x2c   : > { %1380 = vmatprep.subr.bf16.mxu0 %v1598_v2 }
  0x2d   : > { %1349 = vmatpush3.bf16.msra.mxu1 %v1348_v14 }
  0x2e   : > { %1350 = vmatprep.subr.bf16.mxu1 %v1598_v2 }
  0x2f   : > { %1382 = vmatpush3.bf16.msra.mxu0 %v1381_v63 }
  0x30   : > { %1383 = vmatprep.subr.bf16.mxu0 %v1598_v2 }
  0x31   : > { %1352 = vmatpush3.bf16.msra.mxu1 %v1351_v17  ;;  %v1601_v17 = vmov 1.0  }
  0x32   : > { %1353 = vmatprep.subr.bf16.mxu1 %v1598_v2 }
  0x33   : > { %1385 = vmatpush3.bf16.msra.mxu0 %v1384_v3 }
  0x34   : > { %1386 = vmatprep.subr.bf16.mxu0 %v1598_v2 }
  0x35   : > { %1355 = vmatpush3.bf16.msra.mxu1 %v1354_v20  ;;  %v1390_v20 = vpack.c.bf16 %v771_v19, %v770_v18 }
  0x36   : > { %1356 = vmatprep.subr.bf16.mxu1 %v1598_v2 }
  0x37   : > { %1388 = vmatpush3.bf16.msra.mxu0 %v1387_v11 }
  0x38   : > { %1395 = vmatprep.subr.bf16.mxu0 %v1598_v2 }
  0x39   : > { %1358 = vmatpush3.bf16.msra.mxu1 %v1357_v23  ;;  %v855_v23 = vld [vmem:[%s2093_s9] sm:$0xff] }
  0x3a   : > { %1359 = vmatprep.subr.bf16.mxu1 %v1598_v2 }
  0x3d   : > { %1361 = vmatpush3.bf16.msra.mxu1 %v1360_v26  ;;  %v1396_v26 = vpack.c.bf16 %v856_v24, %v855_v23 }
  0x3e   : > { %1362 = vmatprep.subr.bf16.mxu1 %v1598_v2 }
  0x41   : > { %1364 = vmatpush3.bf16.msra.mxu1 %v1363_v29  ;;  %v859_v29 = vld [vmem:[%s2093_s9 + $0x20] sm:$0xff] }
  0x42   : > { %1389 = vmatprep.subr.bf16.mxu1 %v1598_v2 }
  0xf7   : > { %v551_v31 = vpop.f32.mrb[0].mxu1 }
  0xf8   : > { %v552_v32 = vadd.f32 %v1140_v30, %v551_v31  ;;  %v1221_v33 = vpop.f32.mrb[1].mxu1  ;;  %v860_v30 = vld [vmem:[%s2093_s9 + $0x28] sm:$0xff] }
  0xf9   : > { %v1402_v31 = vpack.c.bf16 %v860_v30, %v859_v29  ;;  %v862_v33 = vld [vmem:[%s2093_s9 + $0x38] sm:$0xff] }
  0xfa   : > { %v555_v34 = vmax.f32 %v552_v32, 0.0  ;;  %v861_v32 = vld [vmem:[%s2093_s9 + $0x30] sm:$0xff] }
  0xfc   : > { %1255 = vmatmul.mubr.f32.vlgmr.msra.gmra.mrb[2].mxu1 %v555_v34  ;;  %v1405_v34 = vpack.c.bf16 %v862_v33, %v861_v32 }
  0xfd   : > { %1300 = vmatprep.mubr.msk.f32.mxu1 %vm1599_vm0, %v1600_v4  ;;  %1391 = vmatpush3.bf16.msra.mxu1 %v1390_v20 }
  0xfe   : > { %1392 = vmatprep.subr.bf16.mxu1 %v1598_v2 }
 0x1cf   : > { %v645_v38 = vpop.f32.mrb[2].mxu1 }
 0x1d0   : > { %v646_v39 = vadd.f32 %v1142_v37, %v645_v38  ;;  %v1256_v40 = vpop.f32.mrb[3].mxu1  ;;  %v865_v38 = vld [vmem:[%s2093_s9 + $0x50] sm:$0xff] }
 0x1d2   : > { %v654_v41 = vsel %vm653_vm2, %v646_v39, -inf  ;;  %650 = vst.msk [vmem:[%s2100_s15] sm:$0xff] %vm649_vm3, %v646_v39  ;;  %v866_v39 = vld [vmem:[%s2093_s9 + $0x58] sm:$0xff]  ;;  %s2119_s15 = scalar_lea.vmem [#allocation2], %s1816_s16 }
 0x1d3   : > { %655 = vmax.xlane.f32.xlu0 %v654_v41  ;;  %v1411_v40 = vpack.c.bf16 %v866_v39, %v865_v38  ;;  %s973_s1 = sshll.u32 %s2119_s15, 4  ;;  %s974_s1 = int_to_ptr.vmem [resolvable:$true] %s973_s1 }
 0x1d4   : > { %s1474_s20 = scalar_lea.vmem %s974_s1, 128 }
 0x1d5   : > { %p1475_p11 = scmp.ne.s32.totalorder %s974_s1, %s1474_s20 }
 0x1d7   : > { %p1476_p12 = pnand %p1475_p11, %p1715_p5 }
 0x1d9   : > { %p1477_p13 = pneg %p1476_p12 }
 0x260   : > { %v656_v42 = vpop.xlane.xlu0 %655 }
 0x261   : > { %vm657_vm4 = vcmp.eq.f32.partialorder %v654_v41, %v656_v42  ;;  %v867_v41 = vld [vmem:[%s2093_s9 + $0x60] sm:$0xff]  ;;  %v868_v42 = vld [vmem:[%s2093_s9 + $0x68] sm:$0xff] }
 0x262   : > { %v658_v43 = vsel %vm657_vm4, %v1812_v36, 128 }
 0x263   : > { %v660_v44 = vshra.s32 %v658_v43, 16  ;;  %v659_v5 = vand.u32 65535, %v658_v43  ;;  %v1414_v43 = vpack.c.bf16 %v868_v42, %v867_v41 }
 0x265   : > { %v662_v45 = vcvt.s32.f32 %v660_v44  ;;  %v661_v7 = vcvt.s32.f32 %v659_v5 }
 0x267   : > { %663 = vmin.xlane.f32.xlu0 %v662_v45 }
 0x2f4   : > { %v664_v6 = vpop.xlane.xlu0 %663 }
 0x2f5   : > { %vm665_vm5 = vcmp.eq.f32.partialorder %v662_v45, %v664_v6  ;;  %v670_v12 = vcvt.f32.s32 %v664_v6 }
 0x2f6   : > { %v666_v8 = vsel %vm665_vm5, %v661_v7, inf }
 0x2f7   : > { %667 = vmin.xlane.f32.xlu1 %v666_v8  ;;  %v671_v14 = vshll.u32 %v670_v12, 16 }
 0x384   : > { %v668_v13 = vpop.xlane.xlu1 %667 }
 0x385   : > { %v669_v15 = vcvt.f32.s32 %v668_v13 }
 0x387   : > { %v672_v16 = vadd.s32 %v671_v14, %v669_v15 }
 0x389   : > { %vm673_vm6 = vcmp.eq.s32.totalorder %v1812_v36, %v672_v16  ;;  %v864_v36 = vld [vmem:[%s2093_s9 + $0x48] sm:$0xff] }
 0x38a   : > { %1290 = vmatmul.mubr.msk.f32.vlgmr.msra.gmra.mrb[0].mxu0 %vm673_vm6, %v1601_v17  ;;  %v1408_v37 = vpack.c.bf16 %v864_v36, %v863_v35 }
 0x38b   : > { %1335 = vmatprep.mubr.msk.f32.mxu0 %vm1599_vm0, %v1600_v4  ;;  %v773_v4 = vld [vmem:[%s2091_s7 + $0x18] sm:$0xff]  ;;  %1397 = vmatpush3.bf16.msra.mxu0 %v1396_v26 }
 0x38c   : > { %v1393_v22 = vpack.c.bf16 %v773_v4, %v772_v21  ;;  %1398 = vmatprep.subr.bf16.mxu0 %v1598_v2 }
 0x38e   : > { %1394 = vmatpush3.bf16.msra.mxu1 %v1393_v22 }
 0x38f   : > { %1400 = vmatpush3.bf16.msra.mxu0 %v1399_v28 }
 0x390   : > { %1401 = vmatprep.subr.bf16.mxu0 %v1598_v2 }
 0x393   : > { %1403 = vmatpush3.bf16.msra.mxu0 %v1402_v31 }
 0x394   : > { %1404 = vmatprep.subr.bf16.mxu0 %v1598_v2 }
 0x397   : > { %1406 = vmatpush3.bf16.msra.mxu0 %v1405_v34 }
 0x398   : > { %1407 = vmatprep.subr.bf16.mxu0 %v1598_v2 }
 0x39b   : > { %1409 = vmatpush3.bf16.msra.mxu0 %v1408_v37 }
 0x39c   : > { %1410 = vmatprep.subr.bf16.mxu0 %v1598_v2 }
 0x39f   : > { %1412 = vmatpush3.bf16.msra.mxu0 %v1411_v40 }
 0x3a0   : > { %1413 = vmatprep.subr.bf16.mxu0 %v1598_v2 }
 0x3a3   : > { %1415 = vmatpush3.bf16.msra.mxu0 %v1414_v43 }
 0x3a4   : > { %1416 = vmatprep.subr.bf16.mxu0 %v1598_v2 }
 0x3a7   : > { %1418 = vmatpush3.bf16.msra.mxu0 %v1417_v53 }
 0x45d   : > { %v758_v44 = vpop.f32.mrb[0].mxu0 }
 0x45e   : > { %1472 = vtanh.f32 %v758_v44  ;;  %v1291_v45 = vpop.f32.mrb[1].mxu0 }
 0x468   : > { %v1473_v46 = vpop.eup %1472 }
 0x469   : > { %v765_v47 = vadd.f32 0.5, %v1473_v46  ;;  %764 = vst.msk [vmem:[%s2102_s3] sm:$0xff] %vm763_vm7, %v1473_v46  ;;  %s1478_s3 = sshll.u32 %s1602_s17, 4  ;;  %s1479_s3 = int_to_ptr.vmem [resolvable:$false] %s1478_s3 }
 0x46a   : > { %s1480_s0 = scalar_lea.vmem %s1479_s3, 256  ;;  %p1481_p0 = scmp.lt.s32.totalorder %s974_s1, %s1479_s3 }
 0x46b   : > { %v766_v48 = vmax.f32 %v765_v47, 0.0  ;;  %p1482_p1 = scmp.lt.s32.totalorder %s1480_s0, %s1474_s20 }
 0x46d   : > { %v767_v50 = vmin.f32 %v766_v48, 1.0  ;;  %p1483_p2 = por %p1482_p1, %p1481_p0 }
 0x46f   : > { %v769_v2 = vmul.f32 %v768_v49, %v767_v50  ;;  %p1484_p3 = pnand %p1483_p2, %p1477_p13 }
 0x471   : > { %1301 = vmatmul.mubr.msk.f32.vlgmr.msra.gmra.mrb[4].mxu1 %vm763_vm7, %v769_v2 }
 0x544   : > { %v850_v55 = vpop.f32.mrb[4].mxu1 }
 0x545   : > { %v851_v56 = vadd.f32 %v1145_v54, %v850_v55  ;;  %v1302_v57 = vpop.f32.mrb[5].mxu1 }
 0x547   : > { %v854_v58 = vmax.f32 %v851_v56, 0.0 }
 0x549   : > { %1336 = vmatmul.mubr.f32.vlgmr.msra.gmra.mrb[2].mxu0 %v854_v58 }
 0x54a   : > { %1487 = shalt.err (!%p1484_p3)
}
 0x54b   : > { %s1488_s24 = scalar_lea.hbm %s1972_s22, 128  ;;  %s1492_s21 = scalar_lea.hbm %s2095_s11, 256 }
 0x54c   : > { %p1489_p4 = scmp.ne.s32.totalorder %s1972_s22, %s1488_s24  ;;  %p1493_p9 = scmp.lt.u32.totalorder %s1972_s22, %s2095_s11 }
 0x54d   : > { %p1494_p10 = scmp.lt.u32.totalorder %s1492_s21, %s1488_s24  ;;  %p1496_p12 = scmp.lt.u32.totalorder %s1488_s24, %s1972_s22 }
 0x54e   : > { %p1490_p7 = pnand %p1489_p4, %p1715_p5 }
 0x54f   : > { %p1495_p11 = por %p1494_p10, %p1493_p9 }
 0x550   : > { %p1491_p8 = pneg %p1490_p7 }
 0x551   : > { %p1497_p13 = por %p1496_p12, %p1495_p11 }
 0x553   : > { %p1498_p0 = pnand %p1497_p13, %p1491_p8 }
 0x555   : > { %1501 = shalt.err (!%p1498_p0)
}
 0x556   : > { %1419 = dma.vmem_to_hbm [thread:$0]  (%p1715_p5), %s974_s1, 128, %s1972_s22, %s950_s30   ;;  %v1147_v59 = vld [vmem:[%s2094_s10] ss:$0 sm:$0xff] }
 0x557   : > { %s954_s0 = sand.u32 1, %s1696_s29   ;;  %s455_s15 = scalar_lea.vmem [#allocation4], %s1816_s16 }
 0x558   : > { %s986_s24 = sshll.u32 %s455_s15, 4  ;;  %s2121_s21 = scalar_lea.vmem [#allocation6], %s1816_s16  ;;  %s2008_s24 = int_to_ptr.vmem [resolvable:$true] %s986_s24 }
 0x559   : > { %s999_s17 = sshll.u32 %s2121_s21, 4  ;;  %s2006_s5 = scalar_lea.hbm %s2096_s12, %s1966_s23  ;;  %s2016_s17 = int_to_ptr.vmem [resolvable:$true] %s999_s17 }
 0x55a   : > { %s2014_s1 = scalar_lea.hbm %s2097_s13, %s1966_s23  ;;  %s2019_s16 = scalar_lea.sflag [#allocation5], %s954_s0 }
 0x55b   : > { %s1502_s30 = scalar_lea.vmem %s2008_s24, 128  ;;  %s1603_s4 = smov [#allocation4]  }
 0x55c   : > { %p1503_p1 = scmp.ne.s32.totalorder %s2008_s24, %s1502_s30  ;;  %s1506_s20 = sshll.u32 %s1603_s4, 4  ;;  %s1507_s20 = int_to_ptr.vmem [resolvable:$false] %s1506_s20 }
 0x55d   : > { %s1508_s2 = scalar_lea.vmem %s1507_s20, 256  ;;  %p1509_p4 = scmp.lt.s32.totalorder %s2008_s24, %s1507_s20 }
 0x55e   : > { %p1504_p2 = pnand %p1503_p1, %p1715_p5  ;;  %p1510_p7 = scmp.lt.s32.totalorder %s1508_s2, %s1502_s30 }
 0x560   : > { %p1505_p3 = pneg %p1504_p2  ;;  %p1511_p8 = por %p1510_p7, %p1509_p4 }
 0x562   : > { %p1512_p9 = pnand %p1511_p8, %p1505_p3 }
 0x61c   : > { %v944_v60 = vpop.f32.mrb[2].mxu0 }
 0x61d   : > { %v945_v61 = vadd.f32 %v1147_v59, %v944_v60  ;;  %v1337_v62 = vpop.f32.mrb[3].mxu0 }
 0x61f   : > { %948 = vst.msk [vmem:[%s455_s15] sm:$0xff] %vm649_vm3, %v945_v61 }
 0x620   : > { %1515 = shalt.err (!%p1512_p9)
}
 0x621   : > { %s1516_s23 = scalar_lea.hbm %s2006_s5, 128  ;;  %s1520_s21 = scalar_lea.hbm %s2096_s12, 256 }
 0x622   : > { %p1517_p10 = scmp.ne.s32.totalorder %s2006_s5, %s1516_s23  ;;  %p1521_p13 = scmp.lt.u32.totalorder %s2006_s5, %s2096_s12 }
 0x623   : > { %p1522_p0 = scmp.lt.u32.totalorder %s1520_s21, %s1516_s23  ;;  %p1524_p2 = scmp.lt.u32.totalorder %s1516_s23, %s2006_s5 }
 0x624   : > { %p1518_p11 = pnand %p1517_p10, %p1715_p5 }
 0x625   : > { %p1523_p1 = por %p1522_p0, %p1521_p13 }
 0x626   : > { %p1519_p12 = pneg %p1518_p11 }
 0x627   : > { %p1525_p3 = por %p1524_p2, %p1523_p1 }
 0x629   : > { %p1526_p4 = pnand %p1525_p3, %p1519_p12 }
 0x62b   : > { %1529 = shalt.err (!%p1526_p4)
}
 0x62c   : > { %1420 = dma.vmem_to_hbm [thread:$0]  (%p1715_p5), %s2008_s24, 128, %s2006_s5, %s2019_s16  }
 0x62d   : > { %s1530_s22 = scalar_lea.vmem %s2016_s17, 128  ;;  %s1604_s30 = smov [#allocation6]  }
 0x62e   : > { %p1531_p7 = scmp.ne.s32.totalorder %s2016_s17, %s1530_s22  ;;  %s1534_s4 = sshll.u32 %s1604_s30, 4  ;;  %s1535_s4 = int_to_ptr.vmem [resolvable:$false] %s1534_s4 }
 0x62f   : > { %s1536_s20 = scalar_lea.vmem %s1535_s4, 256  ;;  %p1537_p10 = scmp.lt.s32.totalorder %s2016_s17, %s1535_s4 }
 0x630   : > { %p1532_p8 = pnand %p1531_p7, %p1715_p5  ;;  %p1538_p11 = scmp.lt.s32.totalorder %s1536_s20, %s1530_s22 }
 0x632   : > { %p1533_p9 = pneg %p1532_p8  ;;  %p1539_p12 = por %p1538_p11, %p1537_p10 }
 0x634   : > { %p1540_p13 = pnand %p1539_p12, %p1533_p9 }
 0x636   : > { %1543 = shalt.err (!%p1540_p13)
}
 0x637   : > { %s1544_s5 = scalar_lea.hbm %s2014_s1, 128  ;;  %s1548_s23 = scalar_lea.hbm %s2097_s13, 256 }
 0x638   : > { %p1545_p0 = scmp.ne.s32.totalorder %s2014_s1, %s1544_s5  ;;  %p1549_p3 = scmp.lt.u32.totalorder %s2014_s1, %s2097_s13 }
 0x639   : > { %p1550_p4 = scmp.lt.u32.totalorder %s1548_s23, %s1544_s5  ;;  %p1552_p8 = scmp.lt.u32.totalorder %s1544_s5, %s2014_s1 }
 0x63a   : > { %p1546_p1 = pnand %p1545_p0, %p1715_p5 }
 0x63b   : > { %p1551_p7 = por %p1550_p4, %p1549_p3 }
 0x63c   : > { %p1547_p2 = pneg %p1546_p1 }
 0x63d   : > { %p1553_p9 = por %p1552_p8, %p1551_p7 }
 0x63f   : > { %p1554_p10 = pnand %p1553_p9, %p1547_p2 }
 0x641   : > { %1557 = shalt.err (!%p1554_p10)
}
 0x642   : > { %1421 = dma.vmem_to_hbm [thread:$0]  (%p1715_p5), %s2016_s17, 128, %s2014_s1, %s2019_s16  }
 0x643 PF: > { %p1435_p11 = scmp.ge.s32.totalorder %s1596_s28, 2  ;;  %s1011_s21 = sand.u32 1, %s1584_s25  }
 0x644   : > { %s1012_s3 = scalar_lea.sflag [#allocation3], %s1011_s21 }
 0x645   : > { %p1426_p12 = pnand %p1435_p11, %p1719_p6 }
 0x647   : > { %1575 = dma.done.wait (!%p1426_p12), %s1012_s3, 128  }
 0x648   : > { %1577 = vsyncadd (!%p1426_p12), %s1012_s3, 4294967168  ;;  %s2122_s29 = sadd.s32 4294967294, %s1596_s28  }
 0x649   : > { %s1020_s22 = sand.u32 1, %s2122_s29  }
 0x64a   : > { %s1021_s30 = scalar_lea.sflag [#allocation5], %s1020_s22 }
 0x64b   : > { %1579 = dma.done.wait (!%p1426_p12), %s1021_s30, 256  }
 0x64c   : > { %1581 = vsyncadd (!%p1426_p12), %s1021_s30, 4294967040  ;;  %s2123_s18 = sld [smem:[#allocation9_spill]]  ;;  %p27_p5 = scmp.ge.s32.totalorder %s1700_s14, 4  }
 0x64d   : > { %s2124_s25 = smov %s1588_s26  ;;  %s2125_s26 = smov %s1592_s27 }
 0x64e   : > { %s2127_s28 = smov %s1700_s14  ;;  %29 = sbr.rel (!%p27_p5) target bundleno = 12 (0xc), region = 134 }
 0x652   : > { %s2126_s27 = smov %s2123_s18 }
 0x655   :  { %1035 = vsyncpa [#allocation3], 1 }
 0x656   :  { %1037 = vsyncpa [#allocation3 + $0x1], 1 }
 0x657   :  { %1038 = vsyncpa [#allocation5], 1 }
 0x658   :  { %1040 = vsyncpa [#allocation5 + $0x1], 1 }

</bundles_post_ra>
